<compile_context>
chip_gen: v7x
topology: tpu7x:2x2x1
jax: 0.10.0
libtpu: 0.0.40
codegen_flags: <defaults>
</compile_context>

<pallas_src>
import jax
import jax.numpy as jnp
from jax.experimental import pallas as pl
from jax.experimental.pallas import tpu as pltpu


def _round_up(a, b):
    return ((a + b - 1) // b) * b


# -----------------------------------------------------------------------------
# Kernel 1: VariancePredictor
#   (conv1d k=3 p=1 -> LayerNorm -> ReLU) x2 -> Linear(F->1) -> ReLU
#   One invocation processes the whole (N*Lp, D) row slab (batch folded into M).
# -----------------------------------------------------------------------------
def _make_vp_kernel(N, Lp, L_real):
    rows = N * Lp

    def kernel(x_ref, w1_ref, w2_ref, aux_ref, out_ref):
        # x_ref : (N*Lp, D)   flattened, zero-padded rows for l >= L_real
        # w1_ref: (3, D, F)   conv1 taps (tap k multiplies x[t-1+k])
        # w2_ref: (3, F, F)   conv2 taps
        # aux_ref: (8, F)     rows = b1, g1, be1, b2, g2, be2, wl, [bl, 0...]
        # out_ref: (N, Lp)    lane-dense duration output
        x = x_ref[...].astype(jnp.float32)

        # position of each row inside its batch element (for conv edge masking)
        pos = jax.lax.broadcasted_iota(jnp.int32, (rows, 1), 0) % Lp

        aux = aux_ref[...].astype(jnp.float32)
        b1, g1, be1 = aux[0:1, :], aux[1:2, :], aux[2:3, :]
        b2, g2, be2 = aux[3:4, :], aux[4:5, :], aux[5:6, :]
        wl = aux[6:7, :]            # (1, F)  linear weight row
        bl = aux[7:8, 0:1]          # (1, 1)  linear bias

        def conv3(h, w_ref, b):
            # Conv1d(kernel=3, padding=1) as three shifted matmuls, accumulated.
            # Rolls are full-slab rotations; masks zero the rows that would
            # otherwise leak across batch / sequence boundaries (== zero pad).
            h_prev = jnp.where(pos > 0,
                               pltpu.roll(h, shift=1, axis=0), 0.0)          # h[t-1]
            h_next = jnp.where(pos < L_real - 1,
                               pltpu.roll(h, shift=rows - 1, axis=0), 0.0)   # h[t+1]
            acc = jnp.dot(h_prev, w_ref[0], preferred_element_type=jnp.float32)
            acc = acc + jnp.dot(h, w_ref[1], preferred_element_type=jnp.float32)
            acc = acc + jnp.dot(h_next, w_ref[2], preferred_element_type=jnp.float32)
            return acc + b

        def layernorm(h, g, be, eps=1e-5):
            mu = jnp.mean(h, axis=-1, keepdims=True)
            var = jnp.mean((h - mu) ** 2, axis=-1, keepdims=True)
            return (h - mu) * jax.lax.rsqrt(var + eps) * g + be

        # conv -> LayerNorm -> ReLU (dropout = identity in eval), twice
        h = jnp.maximum(layernorm(conv3(x, w1_ref, b1), g1, be1), 0.0)
        h = jnp.maximum(layernorm(conv3(h, w2_ref, b2), g2, be2), 0.0)

        # Final Linear(F -> 1) + ReLU as VPU multiply + lane reduction,
        # written lane-dense as (N, Lp).
        F = h.shape[-1]
        h3 = h.reshape(N, Lp, F)
        dur = jnp.sum(h3 * wl[None, :, :], axis=-1) + bl       # (N, Lp)
        out_ref[...] = jnp.maximum(dur, 0.0).astype(out_ref.dtype)

    return kernel


def variance_predictor(x, params):
    """x: [N, L, D] float32 -> durations [N, L] float32 (lane-dense)."""
    N, L, D = x.shape
    Lp = _round_up(L, 8)                       # keep sublane tiling aligned
    if Lp != L:
        x = jnp.pad(x, ((0, 0), (0, Lp - L), (0, 0)))
    x2 = x.reshape(N * Lp, D)

    dur = pl.pallas_call(
        _make_vp_kernel(N, Lp, L),
        out_shape=jax.ShapeDtypeStruct((N, Lp), jnp.float32),
    )(x2, params["w1"], params["w2"], params["aux"])
    return dur[:, :L]


# -----------------------------------------------------------------------------
# Kernel 2: Length regulator.  output[n, t, :] = x[n, j, :] for the (unique) j
# with cum[n, j-1] <= t < cum[n, j]; zeros for t beyond the total duration.
# The one-hot alignment tile is generated in-register (never touches HBM).
# -----------------------------------------------------------------------------
def _lr_kernel(prev_ref, cum_ref, x_ref, o_ref):
    # prev_ref/cum_ref: (1, 1, L) int32, x_ref: (1, L, D), o_ref: (1, TT, D)
    tt = o_ref.shape[1]
    L = prev_ref.shape[2]
    t0 = pl.program_id(1) * tt
    t_idx = jax.lax.broadcasted_iota(jnp.int32, (tt, L), 0) + t0       # (TT, L)
    prev = prev_ref[0]                                                  # (1, L)
    cum = cum_ref[0]                                                    # (1, L)
    a = jnp.logical_and(prev <= t_idx, t_idx < cum).astype(jnp.float32)
    o_ref[0] = jnp.dot(a, x_ref[0].astype(jnp.float32),
                       preferred_element_type=jnp.float32).astype(o_ref.dtype)


def length_regulate(x, durations, mel_max_length=None):
    """x: [N, L, D], durations: [N, L] int -> [N, T_out, D] float32."""
    N, L, D = x.shape
    dur_i = durations.astype(jnp.int32)
    cum = jnp.cumsum(dur_i, axis=-1)            # inclusive cumulative durations
    prev = cum - dur_i                          # exclusive cumulative durations

    # Output length must be static; a single scalar readback (no [N,T,L] host
    # matrix, no python loops).  mel_max_length (when given) makes it fully static.
    T_needed = max(int(jnp.max(cum[:, -1])), 1)
    T_out = int(mel_max_length) if mel_max_length is not None else T_needed

    # Tile over T so the output DMA pipelines and both TCs get work (v7x).
    if T_out <= 256:
        tile_t = _round_up(T_out, 8)
        T_pad = tile_t
    else:
        tile_t = 256
        T_pad = _round_up(T_out, tile_t)

    out = pl.pallas_call(
        _lr_kernel,
        out_shape=jax.ShapeDtypeStruct((N, T_pad, D), jnp.float32),
        grid=(N, T_pad // tile_t),
        in_specs=[
            pl.BlockSpec((1, 1, L), lambda i, t: (i, 0, 0)),
            pl.BlockSpec((1, 1, L), lambda i, t: (i, 0, 0)),
            pl.BlockSpec((1, L, D), lambda i, t: (i, 0, 0)),
        ],
        out_specs=pl.BlockSpec((1, tile_t, D), lambda i, t: (i, t, 0)),
        compiler_params=pltpu.CompilerParams(
            dimension_semantics=("parallel", "parallel")),
    )(prev.reshape(N, 1, L), cum.reshape(N, 1, L), x)

    # Rows beyond each sequence's total duration are already zero (alignment is
    # all-false there), which is exactly F.pad's zero padding.
    return out[:, :T_out, :]


# -----------------------------------------------------------------------------
# LengthRegulator forward (eval mode)
# -----------------------------------------------------------------------------
def length_regulator_forward(x, params, target=None, alpha=1.0, mel_max_length=None):
    N, L, D = x.shape
    dur_pred = variance_predictor(x, params)            # [N, L]
    # PyTorch eval: out.squeeze().unsqueeze(0) -> [1, N, L]
    duration_predictor_output = dur_pred[None, :, :]

    if target is not None:
        lr_output = length_regulate(x, target, mel_max_length)
        return lr_output, duration_predictor_output

    # Inference path: round predicted durations and expand.
    # TODO(synk): the original applies LR to the eval-mode [1, N, L] tensor; we use
    # the per-batch [N, L] durations (training-mode squeeze shape) instead.
    dur_int = ((dur_pred + 0.5) * alpha).astype(jnp.int32)
    lr_output = length_regulate(x, dur_int)
    mel_pos = jnp.arange(1, lr_output.shape[1] + 1, dtype=jnp.int32)[None, :]
    return lr_output, mel_pos


# -----------------------------------------------------------------------------
# Deterministic parameter init (shapes per VariancePredictor.__init__)
# -----------------------------------------------------------------------------
def init_params(key, encoder_dim, filter_size, kernel_size=3):
    D, F = encoder_dim, filter_size
    keys = jax.random.split(key, 6)
    scale = 0.1
    # PyTorch Conv1d weights are [out, in, k]; repack to [k, in, out] so tap k
    # multiplies x[t - 1 + k].
    conv1 = jax.random.normal(keys[0], (F, D, kernel_size), jnp.float32) * scale
    conv2 = jax.random.normal(keys[1], (F, F, kernel_size), jnp.float32) * scale
    lin_w = jax.random.normal(keys[2], (F,), jnp.float32) * scale
    b1 = jax.random.normal(keys[3], (F,), jnp.float32) * scale
    b2 = jax.random.normal(keys[4], (F,), jnp.float32) * scale
    bl = jax.random.normal(keys[5], (), jnp.float32) * scale
    aux = jnp.stack([
        b1, jnp.ones((F,), jnp.float32), jnp.zeros((F,), jnp.float32),   # conv1 bias, LN1 gamma/beta
        b2, jnp.ones((F,), jnp.float32), jnp.zeros((F,), jnp.float32),   # conv2 bias, LN2 gamma/beta
        lin_w,                                                            # linear weight
        jnp.zeros((F,), jnp.float32).at[0].set(bl),                       # linear bias in [.,0]
    ], axis=0)                                                            # (8, F)
    return {
        "w1": jnp.transpose(conv1, (2, 1, 0)),    # (3, D, F)
        "w2": jnp.transpose(conv2, (2, 1, 0)),    # (3, F, F)
        "aux": aux,
    }


# -----------------------------------------------------------------------------
# Pure-JAX references (for correctness checks only)
# -----------------------------------------------------------------------------
def _variance_predictor_ref(x, params):
    w1, w2, aux = params["w1"], params["w2"], params["aux"]
    hp = jax.lax.Precision.HIGHEST

    def conv3(h, w, b):
        h_prev = jnp.pad(h, ((0, 0), (1, 0), (0, 0)))[:, :-1]
        h_next = jnp.pad(h, ((0, 0), (0, 1), (0, 0)))[:, 1:]
        return (jnp.einsum("nlc,cf->nlf", h_prev, w[0], precision=hp)
                + jnp.einsum("nlc,cf->nlf", h, w[1], precision=hp)
                + jnp.einsum("nlc,cf->nlf", h_next, w[2], precision=hp) + b)

    def ln(h, g, be, eps=1e-5):
        mu = h.mean(-1, keepdims=True)
        var = ((h - mu) ** 2).mean(-1, keepdims=True)
        return (h - mu) * jax.lax.rsqrt(var + eps) * g + be

    h = jnp.maximum(ln(conv3(x, w1, aux[0]), aux[1], aux[2]), 0.0)
    h = jnp.maximum(ln(conv3(h, w2, aux[3]), aux[4], aux[5]), 0.0)
    return jnp.maximum(jnp.sum(h * aux[6], -1) + aux[7, 0], 0.0)   # (N, L)


def _length_regulate_ref(x, durations):
    dur = durations.astype(jnp.int32)
    cum = jnp.cumsum(dur, -1)
    prev = cum - dur
    T = int(jnp.max(cum[:, -1]))
    t = jnp.arange(T)[None, :, None]
    align = ((prev[:, None, :] <= t) & (t < cum[:, None, :])).astype(x.dtype)
    return jnp.einsum("ntl,nld->ntd", align, x, precision=jax.lax.Precision.HIGHEST)


if __name__ == "__main__":
    key = jax.random.PRNGKey(0)
    k_x, k_p, k_t = jax.random.split(key, 3)

    N, L, D, F = 2, 8, 32, 32     # batch, seq, encoder_dim, duration_predictor_filter_size
    x = jax.random.normal(k_x, (N, L, D), jnp.float32)
    params = init_params(k_p, D, F)
    target = jax.random.randint(k_t, (N, L), 1, 4, dtype=jnp.int32)   # ground-truth durations

    lr_out, dur_out = length_regulator_forward(x, params, target=target)
    jax.block_until_ready(lr_out)
    jax.block_until_ready(dur_out)

    # shape sanity
    T = int(jnp.max(jnp.sum(target, -1)))
    assert lr_out.shape == (N, T, D), lr_out.shape
    assert dur_out.shape == (1, N, L), dur_out.shape
    assert bool(jnp.all(dur_out >= 0.0))

    # numerical sanity vs pure-JAX references
    dur_ref = _variance_predictor_ref(x, params)
    assert bool(jnp.allclose(dur_out[0], dur_ref, atol=1e-3, rtol=1e-3))
    lr_ref = _length_regulate_ref(x, target)
    assert bool(jnp.allclose(lr_out, lr_ref, atol=1e-3, rtol=1e-3))

    print("KERNEL_OK")
</pallas_src>

<mosaic_0001>
module attributes {stable_mosaic.version = 11 : i64} {
  func.func @kernel(%arg0: memref<16x32xf32, #tpu.memory_space<vmem>>, %arg1: memref<3x32x32xf32, #tpu.memory_space<vmem>>, %arg2: memref<3x32x32xf32, #tpu.memory_space<vmem>>, %arg3: memref<8x32xf32, #tpu.memory_space<vmem>>, %arg4: memref<2x8xf32, #tpu.memory_space<vmem>>) attributes {dimension_semantics = [], scalar_prefetch = 0 : i64, scratch_operands = 0 : i64, tpu.core_type = #tpu.core_type<tc>} {
    %c0 = arith.constant 0 : index
    %c0_0 = arith.constant 0 : index
    %0 = vector.load %arg0[%c0, %c0_0] : memref<16x32xf32, #tpu.memory_space<vmem>>, vector<16x32xf32>
    %1 = tpu.iota {dimensions = array<i32: 0>} : vector<16x1xi32>
    %c8_i32 = arith.constant 8 : i32
    %c0_i32 = arith.constant 0 : i32
    %2 = arith.cmpi eq, %c8_i32, %c0_i32 : i32
    %c1_i32 = arith.constant 1 : i32
    %3 = arith.select %2, %c1_i32, %c8_i32 : i32
    %4 = vector.broadcast %3 : i32 to vector<16x1xi32>
    %5 = arith.remsi %1, %4 : vector<16x1xi32>
    %c0_i32_1 = arith.constant 0 : i32
    %6 = vector.broadcast %c0_i32_1 : i32 to vector<16x1xi32>
    %7 = arith.cmpi ne, %5, %6 : vector<16x1xi32>
    %c0_i32_2 = arith.constant 0 : i32
    %8 = vector.broadcast %c0_i32_2 : i32 to vector<16x1xi32>
    %9 = arith.cmpi slt, %5, %8 : vector<16x1xi32>
    %c0_i32_3 = arith.constant 0 : i32
    %10 = arith.cmpi slt, %3, %c0_i32_3 : i32
    %11 = vector.broadcast %10 : i1 to vector<16x1xi1>
    %12 = vector.broadcast %11 : vector<16x1xi1> to vector<16x1xi1>
    %13 = arith.xori %9, %12 : vector<16x1xi1>
    %14 = arith.andi %13, %7 : vector<16x1xi1>
    %15 = vector.broadcast %3 : i32 to vector<16x1xi32>
    %16 = arith.addi %5, %15 : vector<16x1xi32>
    %17 = arith.select %14, %16, %5 : vector<16x1xi1>, vector<16x1xi32>
    %c0_4 = arith.constant 0 : index
    %c0_5 = arith.constant 0 : index
    %18 = vector.load %arg3[%c0_4, %c0_5] : memref<8x32xf32, #tpu.memory_space<vmem>>, vector<8x32xf32>
    %19 = vector.extract_strided_slice %18 {offsets = [0, 0], sizes = [1, 32], strides = [1, 1]} : vector<8x32xf32> to vector<1x32xf32>
    %20 = vector.extract_strided_slice %18 {offsets = [1, 0], sizes = [1, 32], strides = [1, 1]} : vector<8x32xf32> to vector<1x32xf32>
    %21 = vector.extract_strided_slice %18 {offsets = [2, 0], sizes = [1, 32], strides = [1, 1]} : vector<8x32xf32> to vector<1x32xf32>
    %22 = vector.extract_strided_slice %18 {offsets = [3, 0], sizes = [1, 32], strides = [1, 1]} : vector<8x32xf32> to vector<1x32xf32>
    %23 = vector.extract_strided_slice %18 {offsets = [4, 0], sizes = [1, 32], strides = [1, 1]} : vector<8x32xf32> to vector<1x32xf32>
    %24 = vector.extract_strided_slice %18 {offsets = [5, 0], sizes = [1, 32], strides = [1, 1]} : vector<8x32xf32> to vector<1x32xf32>
    %25 = vector.extract_strided_slice %18 {offsets = [6, 0], sizes = [1, 32], strides = [1, 1]} : vector<8x32xf32> to vector<1x32xf32>
    %26 = vector.extract_strided_slice %18 {offsets = [7, 0], sizes = [1, 1], strides = [1, 1]} : vector<8x32xf32> to vector<1x1xf32>
    %c0_i32_6 = arith.constant 0 : i32
    %27 = vector.broadcast %c0_i32_6 : i32 to vector<16x1xi32>
    %28 = arith.cmpi sgt, %17, %27 : vector<16x1xi32>
    %c1_i32_7 = arith.constant 1 : i32
    %29 = tpu.dynamic_rotate %0 by %c1_i32_7 dim 0 : vector<16x32xf32>, i32 -> vector<16x32xf32>
    %cst = arith.constant 0.000000e+00 : f32
    %30 = vector.shape_cast %28 : vector<16x1xi1> to vector<16x1xi1>
    %31 = vector.broadcast %30 : vector<16x1xi1> to vector<16x32xi1>
    %32 = vector.broadcast %cst : f32 to vector<16x32xf32>
    %33 = arith.select %31, %29, %32 : vector<16x32xi1>, vector<16x32xf32>
    %c7_i32 = arith.constant 7 : i32
    %34 = vector.broadcast %c7_i32 : i32 to vector<16x1xi32>
    %35 = arith.cmpi slt, %17, %34 : vector<16x1xi32>
    %c15_i32 = arith.constant 15 : i32
    %36 = tpu.dynamic_rotate %0 by %c15_i32 dim 0 : vector<16x32xf32>, i32 -> vector<16x32xf32>
    %cst_8 = arith.constant 0.000000e+00 : f32
    %37 = vector.shape_cast %35 : vector<16x1xi1> to vector<16x1xi1>
    %38 = vector.broadcast %37 : vector<16x1xi1> to vector<16x32xi1>
    %39 = vector.broadcast %cst_8 : f32 to vector<16x32xf32>
    %40 = arith.select %38, %36, %39 : vector<16x32xi1>, vector<16x32xf32>
    %c0_9 = arith.constant 0 : index
    %c0_10 = arith.constant 0 : index
    %c0_11 = arith.constant 0 : index
    %41 = vector.load %arg1[%c0_9, %c0_10, %c0_11] : memref<3x32x32xf32, #tpu.memory_space<vmem>>, vector<1x32x32xf32>
    %42 = vector.shape_cast %41 : vector<1x32x32xf32> to vector<32x32xf32>
    %cst_12 = arith.constant dense<0.000000e+00> : vector<16x32xf32>
    %43 = tpu.matmul %33, %42, %cst_12 {dimension_numbers = #tpu.dot_dimension_numbers<[1], [0], [0], [1], [0, 0, 1, 1], [], []>} : vector<16x32xf32>, vector<32x32xf32>, vector<16x32xf32> -> vector<16x32xf32>
    %c1 = arith.constant 1 : index
    %c0_13 = arith.constant 0 : index
    %c0_14 = arith.constant 0 : index
    %44 = vector.load %arg1[%c1, %c0_13, %c0_14] : memref<3x32x32xf32, #tpu.memory_space<vmem>>, vector<1x32x32xf32>
    %45 = vector.shape_cast %44 : vector<1x32x32xf32> to vector<32x32xf32>
    %cst_15 = arith.constant dense<0.000000e+00> : vector<16x32xf32>
    %46 = tpu.matmul %0, %45, %cst_15 {dimension_numbers = #tpu.dot_dimension_numbers<[1], [0], [0], [1], [0, 0, 1, 1], [], []>} : vector<16x32xf32>, vector<32x32xf32>, vector<16x32xf32> -> vector<16x32xf32>
    %47 = arith.addf %43, %46 : vector<16x32xf32>
    %c2 = arith.constant 2 : index
    %c0_16 = arith.constant 0 : index
    %c0_17 = arith.constant 0 : index
    %48 = vector.load %arg1[%c2, %c0_16, %c0_17] : memref<3x32x32xf32, #tpu.memory_space<vmem>>, vector<1x32x32xf32>
    %49 = vector.shape_cast %48 : vector<1x32x32xf32> to vector<32x32xf32>
    %cst_18 = arith.constant dense<0.000000e+00> : vector<16x32xf32>
    %50 = tpu.matmul %40, %49, %cst_18 {dimension_numbers = #tpu.dot_dimension_numbers<[1], [0], [0], [1], [0, 0, 1, 1], [], []>} : vector<16x32xf32>, vector<32x32xf32>, vector<16x32xf32> -> vector<16x32xf32>
    %51 = arith.addf %47, %50 : vector<16x32xf32>
    %52 = vector.broadcast %19 : vector<1x32xf32> to vector<16x32xf32>
    %53 = arith.addf %51, %52 : vector<16x32xf32>
    %cst_19 = arith.constant dense<0.000000e+00> : vector<16xf32>
    %54 = vector.multi_reduction <add>, %53, %cst_19 [1] : vector<16x32xf32> to vector<16xf32>
    %55 = vector.shape_cast %54 : vector<16xf32> to vector<16x1xf32>
    %cst_20 = arith.constant 3.200000e+01 : f32
    %56 = vector.broadcast %cst_20 : f32 to vector<16x1xf32>
    %57 = arith.divf %55, %56 : vector<16x1xf32>
    %58 = vector.broadcast %57 : vector<16x1xf32> to vector<16x32xf32>
    %59 = arith.subf %53, %58 : vector<16x32xf32>
    %60 = arith.mulf %59, %59 : vector<16x32xf32>
    %cst_21 = arith.constant dense<0.000000e+00> : vector<16xf32>
    %61 = vector.multi_reduction <add>, %60, %cst_21 [1] : vector<16x32xf32> to vector<16xf32>
    %62 = vector.shape_cast %61 : vector<16xf32> to vector<16x1xf32>
    %cst_22 = arith.constant 3.200000e+01 : f32
    %63 = vector.broadcast %cst_22 : f32 to vector<16x1xf32>
    %64 = arith.divf %62, %63 : vector<16x1xf32>
    %65 = vector.broadcast %57 : vector<16x1xf32> to vector<16x32xf32>
    %66 = arith.subf %53, %65 : vector<16x32xf32>
    %cst_23 = arith.constant 9.99999974E-6 : f32
    %67 = vector.broadcast %cst_23 : f32 to vector<16x1xf32>
    %68 = arith.addf %64, %67 : vector<16x1xf32>
    %69 = math.rsqrt %68 : vector<16x1xf32>
    %70 = vector.broadcast %69 : vector<16x1xf32> to vector<16x32xf32>
    %71 = arith.mulf %66, %70 : vector<16x32xf32>
    %72 = vector.broadcast %20 : vector<1x32xf32> to vector<16x32xf32>
    %73 = arith.mulf %71, %72 : vector<16x32xf32>
    %74 = vector.broadcast %21 : vector<1x32xf32> to vector<16x32xf32>
    %75 = arith.addf %73, %74 : vector<16x32xf32>
    %cst_24 = arith.constant 0.000000e+00 : f32
    %76 = vector.broadcast %cst_24 : f32 to vector<16x32xf32>
    %77 = arith.maximumf %75, %76 : vector<16x32xf32>
    %c0_i32_25 = arith.constant 0 : i32
    %78 = vector.broadcast %c0_i32_25 : i32 to vector<16x1xi32>
    %79 = arith.cmpi sgt, %17, %78 : vector<16x1xi32>
    %c1_i32_26 = arith.constant 1 : i32
    %80 = tpu.dynamic_rotate %77 by %c1_i32_26 dim 0 : vector<16x32xf32>, i32 -> vector<16x32xf32>
    %cst_27 = arith.constant 0.000000e+00 : f32
    %81 = vector.shape_cast %79 : vector<16x1xi1> to vector<16x1xi1>
    %82 = vector.broadcast %81 : vector<16x1xi1> to vector<16x32xi1>
    %83 = vector.broadcast %cst_27 : f32 to vector<16x32xf32>
    %84 = arith.select %82, %80, %83 : vector<16x32xi1>, vector<16x32xf32>
    %c7_i32_28 = arith.constant 7 : i32
    %85 = vector.broadcast %c7_i32_28 : i32 to vector<16x1xi32>
    %86 = arith.cmpi slt, %17, %85 : vector<16x1xi32>
    %c15_i32_29 = arith.constant 15 : i32
    %87 = tpu.dynamic_rotate %77 by %c15_i32_29 dim 0 : vector<16x32xf32>, i32 -> vector<16x32xf32>
    %cst_30 = arith.constant 0.000000e+00 : f32
    %88 = vector.shape_cast %86 : vector<16x1xi1> to vector<16x1xi1>
    %89 = vector.broadcast %88 : vector<16x1xi1> to vector<16x32xi1>
    %90 = vector.broadcast %cst_30 : f32 to vector<16x32xf32>
    %91 = arith.select %89, %87, %90 : vector<16x32xi1>, vector<16x32xf32>
    %c0_31 = arith.constant 0 : index
    %c0_32 = arith.constant 0 : index
    %c0_33 = arith.constant 0 : index
    %92 = vector.load %arg2[%c0_31, %c0_32, %c0_33] : memref<3x32x32xf32, #tpu.memory_space<vmem>>, vector<1x32x32xf32>
    %93 = vector.shape_cast %92 : vector<1x32x32xf32> to vector<32x32xf32>
    %cst_34 = arith.constant dense<0.000000e+00> : vector<16x32xf32>
    %94 = tpu.matmul %84, %93, %cst_34 {dimension_numbers = #tpu.dot_dimension_numbers<[1], [0], [0], [1], [0, 0, 1, 1], [], []>} : vector<16x32xf32>, vector<32x32xf32>, vector<16x32xf32> -> vector<16x32xf32>
    %c1_35 = arith.constant 1 : index
    %c0_36 = arith.constant 0 : index
    %c0_37 = arith.constant 0 : index
    %95 = vector.load %arg2[%c1_35, %c0_36, %c0_37] : memref<3x32x32xf32, #tpu.memory_space<vmem>>, vector<1x32x32xf32>
    %96 = vector.shape_cast %95 : vector<1x32x32xf32> to vector<32x32xf32>
    %cst_38 = arith.constant dense<0.000000e+00> : vector<16x32xf32>
    %97 = tpu.matmul %77, %96, %cst_38 {dimension_numbers = #tpu.dot_dimension_numbers<[1], [0], [0], [1], [0, 0, 1, 1], [], []>} : vector<16x32xf32>, vector<32x32xf32>, vector<16x32xf32> -> vector<16x32xf32>
    %98 = arith.addf %94, %97 : vector<16x32xf32>
    %c2_39 = arith.constant 2 : index
    %c0_40 = arith.constant 0 : index
    %c0_41 = arith.constant 0 : index
    %99 = vector.load %arg2[%c2_39, %c0_40, %c0_41] : memref<3x32x32xf32, #tpu.memory_space<vmem>>, vector<1x32x32xf32>
    %100 = vector.shape_cast %99 : vector<1x32x32xf32> to vector<32x32xf32>
    %cst_42 = arith.constant dense<0.000000e+00> : vector<16x32xf32>
    %101 = tpu.matmul %91, %100, %cst_42 {dimension_numbers = #tpu.dot_dimension_numbers<[1], [0], [0], [1], [0, 0, 1, 1], [], []>} : vector<16x32xf32>, vector<32x32xf32>, vector<16x32xf32> -> vector<16x32xf32>
    %102 = arith.addf %98, %101 : vector<16x32xf32>
    %103 = vector.broadcast %22 : vector<1x32xf32> to vector<16x32xf32>
    %104 = arith.addf %102, %103 : vector<16x32xf32>
    %cst_43 = arith.constant dense<0.000000e+00> : vector<16xf32>
    %105 = vector.multi_reduction <add>, %104, %cst_43 [1] : vector<16x32xf32> to vector<16xf32>
    %106 = vector.shape_cast %105 : vector<16xf32> to vector<16x1xf32>
    %cst_44 = arith.constant 3.200000e+01 : f32
    %107 = vector.broadcast %cst_44 : f32 to vector<16x1xf32>
    %108 = arith.divf %106, %107 : vector<16x1xf32>
    %109 = vector.broadcast %108 : vector<16x1xf32> to vector<16x32xf32>
    %110 = arith.subf %104, %109 : vector<16x32xf32>
    %111 = arith.mulf %110, %110 : vector<16x32xf32>
    %cst_45 = arith.constant dense<0.000000e+00> : vector<16xf32>
    %112 = vector.multi_reduction <add>, %111, %cst_45 [1] : vector<16x32xf32> to vector<16xf32>
    %113 = vector.shape_cast %112 : vector<16xf32> to vector<16x1xf32>
    %cst_46 = arith.constant 3.200000e+01 : f32
    %114 = vector.broadcast %cst_46 : f32 to vector<16x1xf32>
    %115 = arith.divf %113, %114 : vector<16x1xf32>
    %116 = vector.broadcast %108 : vector<16x1xf32> to vector<16x32xf32>
    %117 = arith.subf %104, %116 : vector<16x32xf32>
    %cst_47 = arith.constant 9.99999974E-6 : f32
    %118 = vector.broadcast %cst_47 : f32 to vector<16x1xf32>
    %119 = arith.addf %115, %118 : vector<16x1xf32>
    %120 = math.rsqrt %119 : vector<16x1xf32>
    %121 = vector.broadcast %120 : vector<16x1xf32> to vector<16x32xf32>
    %122 = arith.mulf %117, %121 : vector<16x32xf32>
    %123 = vector.broadcast %23 : vector<1x32xf32> to vector<16x32xf32>
    %124 = arith.mulf %122, %123 : vector<16x32xf32>
    %125 = vector.broadcast %24 : vector<1x32xf32> to vector<16x32xf32>
    %126 = arith.addf %124, %125 : vector<16x32xf32>
    %cst_48 = arith.constant 0.000000e+00 : f32
    %127 = vector.broadcast %cst_48 : f32 to vector<16x32xf32>
    %128 = arith.maximumf %126, %127 : vector<16x32xf32>
    %129 = vector.shape_cast %128 : vector<16x32xf32> to vector<2x8x32xf32>
    %130 = vector.shape_cast %25 : vector<1x32xf32> to vector<1x1x32xf32>
    %131 = vector.broadcast %130 : vector<1x1x32xf32> to vector<2x8x32xf32>
    %132 = arith.mulf %129, %131 : vector<2x8x32xf32>
    %cst_49 = arith.constant dense<0.000000e+00> : vector<2x8xf32>
    %133 = vector.multi_reduction <add>, %132, %cst_49 [2] : vector<2x8x32xf32> to vector<2x8xf32>
    %134 = vector.broadcast %26 : vector<1x1xf32> to vector<2x8xf32>
    %135 = arith.addf %133, %134 : vector<2x8xf32>
    %cst_50 = arith.constant 0.000000e+00 : f32
    %136 = vector.broadcast %cst_50 : f32 to vector<2x8xf32>
    %137 = arith.maximumf %135, %136 : vector<2x8xf32>
    %c0_51 = arith.constant 0 : index
    %c0_52 = arith.constant 0 : index
    %138 = vector.load %arg4[%c0_51, %c0_52] : memref<2x8xf32, #tpu.memory_space<vmem>>, vector<2x8xf32>
    tpu.vector_store %arg4[%c0_51, %c0_52], %137 {strides = array<i32>} : memref<2x8xf32, #tpu.memory_space<vmem>>, vector<2x8xf32>,
    return
  }
}

</mosaic_0001>

<bundles_post_ra>
// kernel: tpu_custom_call.1
= control target key start
LH: loop header
LB: loop body
LE: loop exit
PB: predicated region body
PF: predicated region fallthrough
CT: control target
= control target key end

     0   :  { %9 = vsyncpa [#allocation3], 0  ;;  %s1267_s0 = inlined_call_operand.hbm [shape: f32[16,32], index: 0, kind: input, shape index: {}]   ;;  %s1268_s1 = inlined_call_operand.hbm [shape: f32[3,32,32], index: 1, kind: input, shape index: {}]   ;;  %s1269_s2 = inlined_call_operand.hbm [shape: f32[3,32,32], index: 2, kind: input, shape index: {}]   ;;  %s1270_s3 = inlined_call_operand.vmem [shape: f32[8,32], index: 3, kind: input, shape index: {}]   ;;  %s1271_s4 = inlined_call_operand.hbm [shape: f32[2,8], index: 4, kind: output, shape index: {}]  }
   0x1   :  { %10 = vsyncpa [#allocation6], 0 }
   0x2   :  { %11 = vsyncpa [#allocation4], 0  ;;  %s1073_s15 = smov [#allocation5]   ;;  %s1074_s17 = smov [#allocation2]  }
   0x3   :  { %s29_s16 = sshll.u32 %s1073_s15, 4  ;;  %s17_s18 = sshll.u32 %s1074_s17, 4  ;;  %s30_s16 = int_to_ptr.vmem [resolvable:$true] %s29_s16  ;;  %s1104_s18 = int_to_ptr.vmem [resolvable:$true] %s17_s18 }
   0x4   :  { %s979_s21 = scalar_lea.hbm %s1268_s1, 1536 }
   0x5   :  { %p980_p0 = scmp.ne.s32.totalorder %s1268_s1, %s979_s21  ;;  %p983_p1 = scmp.lt.u32.totalorder %s979_s21, %s1268_s1 }
   0x7   :  { %p985_p2 = pnand %p983_p1, %p980_p0 }
   0x9   :  { %988 = shalt.err (!%p985_p2)
}
   0xa   :  { %s989_s26 = scalar_lea.vmem %s30_s16, 1536  ;;  %p994_p4 = scmp.lt.s32.totalorder %s30_s16, %s30_s16 }
   0xb   :  { %p990_p3 = scmp.ne.s32.totalorder %s30_s16, %s989_s26  ;;  %p995_p5 = scmp.lt.s32.totalorder %s989_s26, %s989_s26 }
   0xd   :  { %p996_p6 = por %p995_p5, %p994_p4 }
   0xf   :  { %p997_p7 = pnand %p996_p6, %p990_p3 }
  0x11   :  { %1000 = shalt.err (!%p997_p7)
}
  0x12   :  { %s1075_s27 = smov 128   ;;  %s1076_s28 = smov 8  }
  0x13   :  { %35 = dma.hbm_to_vmem [thread:$0]  %s1268_s1, 1536, %s30_s16, [#allocation6], %s1075_s27, %s1075_s27, %s1076_s28  }
  0x14   :  { %s1001_s7 = scalar_lea.hbm %s1267_s0, 256 }
  0x15   :  { %p1002_p8 = scmp.ne.s32.totalorder %s1267_s0, %s1001_s7  ;;  %p1005_p9 = scmp.lt.u32.totalorder %s1001_s7, %s1267_s0 }
  0x17   :  { %p1007_p10 = pnand %p1005_p9, %p1002_p8 }
  0x19   :  { %1010 = shalt.err (!%p1007_p10)
}
  0x1a   :  { %s1011_s12 = scalar_lea.vmem %s1104_s18, 256  ;;  %p1016_p12 = scmp.lt.s32.totalorder %s1104_s18, %s1104_s18 }
  0x1b   :  { %p1012_p11 = scmp.ne.s32.totalorder %s1104_s18, %s1011_s12  ;;  %p1017_p13 = scmp.lt.s32.totalorder %s1011_s12, %s1011_s12 }
  0x1d   :  { %p1018_p0 = por %p1017_p13, %p1016_p12 }
  0x1f   :  { %p1019_p1 = pnand %p1018_p0, %p1012_p11 }
  0x21   :  { %1022 = shalt.err (!%p1019_p1)
}
  0x22   :  { %23 = dma.hbm_to_vmem [thread:$0]  %s1267_s0, 256, %s1104_s18, [#allocation3], %s1075_s27, %s1075_s27, %s1076_s28  }
  0x23   :  { %s1077_s14 = smov [#allocation7]   ;;  %s1023_s19 = scalar_lea.hbm %s1269_s2, 1536 }
  0x24   :  { %s41_s15 = sshll.u32 %s1077_s14, 4  ;;  %p1024_p2 = scmp.ne.s32.totalorder %s1269_s2, %s1023_s19  ;;  %s42_s15 = int_to_ptr.vmem [resolvable:$true] %s41_s15 }
  0x25   :  { %p1027_p3 = scmp.lt.u32.totalorder %s1023_s19, %s1269_s2 }
  0x27   :  { %p1029_p4 = pnand %p1027_p3, %p1024_p2 }
  0x29   :  { %1032 = shalt.err (!%p1029_p4)
}
  0x2a   :  { %s1033_s24 = scalar_lea.vmem %s42_s15, 1536  ;;  %p1038_p6 = scmp.lt.s32.totalorder %s42_s15, %s42_s15 }
  0x2b   :  { %p1034_p5 = scmp.ne.s32.totalorder %s42_s15, %s1033_s24  ;;  %p1039_p7 = scmp.lt.s32.totalorder %s1033_s24, %s1033_s24 }
  0x2d   :  { %p1040_p8 = por %p1039_p7, %p1038_p6 }
  0x2f   :  { %p1041_p9 = pnand %p1040_p8, %p1034_p5 }
  0x31   :  { %1044 = shalt.err (!%p1041_p9)
}
  0x32   :  { %47 = dma.hbm_to_vmem [thread:$0]  %s1269_s2, 1536, %s42_s15, [#allocation6], %s1075_s27, %s1075_s27, %s1076_s28  }
  0x33   :  { %1067 = dma.done.wait [#allocation3], 256  }
  0x34   :  { %1068 = vsyncadd [#allocation3], 4294967040 }
  0x35   :  { %1069 = dma.done.wait [#allocation6], 3072  }
  0x36   :  { %1070 = vsyncadd [#allocation6], 4294964224  ;;  %v61_v0 = vlaneseq  ;;  %vm124_vm0 = vcmask 261120   ;;  %v120_v2 = vld [vmem:[#allocation5 + $0x20] sm:$0xff]  ;;  %v121_v3 = vld [vmem:[#allocation5 + $0x28] sm:$0xff]  ;;  %s1078_s26 = smov [#allocation8]  }
  0x37   :  { %v122_v4 = vld [vmem:[#allocation5 + $0x30] sm:$0xff]  ;;  %v907_v5 = vpack.c.bf16 %v121_v3, %v120_v2  ;;  %v123_v6 = vld [vmem:[#allocation5 + $0x38] sm:$0xff]  ;;  %v115_v12 = vld [vmem:[#allocation5] sm:$0xff]  ;;  %s783_s27 = sshll.u32 %s1078_s26, 4  ;;  %vm772_vm7 = vcmask 1041409   ;;  %vm775_vm8 = vcmask 58368   ;;  %s784_s27 = int_to_ptr.vmem [resolvable:$true] %s783_s27 }
  0x38   :  { %v1157_v1 = vshrl.u32 %v61_v0, 7  ;;  %v59_v7 = vld [vmem:[#allocation2] sm:$0xff]  ;;  %v60_v8 = vld [vmem:[#allocation2 + $0x8] sm:$0xff]  ;;  %v911_v9 = vpack.c.bf16 %v123_v6, %v122_v4  ;;  %v116_v13 = vld [vmem:[#allocation5 + $0x8] sm:$0xff]  ;;  %s1045_s28 = scalar_lea.vmem %s784_s27, 32  ;;  %p1050_p11 = scmp.lt.s32.totalorder %s784_s27, %s784_s27 }
  0x39   :  { %v91_v10 = vrot.slane %v59_v7, 7  ;;  %849 = vmatprep.mubr.msk.f32.mxu0 %vm124_vm0, %v59_v7  ;;  %v92_v11 = vrot.slane %v60_v8, 7  ;;  %908 = vmatprep.subr.bf16.mxu0 %v907_v5  ;;  %v915_v15 = vpack.c.bf16 %v116_v13, %v115_v12  ;;  %v117_v17 = vld [vmem:[#allocation5 + $0x10] sm:$0xff]  ;;  %v118_v18 = vld [vmem:[#allocation5 + $0x18] sm:$0xff]  ;;  %v104_v24 = vrot.slane %v59_v7, 1  ;;  %v288_v26 = vld [vmem:[#allocation5 + $0x40] sm:$0xff]  ;;  %p1046_p10 = scmp.ne.s32.totalorder %s784_s27, %s1045_s28  ;;  %p1051_p12 = scmp.lt.s32.totalorder %s1045_s28, %s1045_s28 }
  0x3a   :  { %v68_v14 = vand.u32 7, %v1157_v1  ;;  %vm93_vm1 = vcmp.lt.s32.totalorder %v1157_v1, 1  ;;  %910 = vmatpush3.bf16.msra.mxu0 %v907_v5  ;;  %v63_v16 = vadd.s32 8, %v1157_v1  ;;  %v919_v21 = vpack.c.bf16 %v118_v18, %v117_v17  ;;  %v289_v27 = vld [vmem:[#allocation5 + $0x48] sm:$0xff]  ;;  %v290_v31 = vld [vmem:[#allocation5 + $0x50] sm:$0xff]  ;;  %v291_v32 = vld [vmem:[#allocation5 + $0x58] sm:$0xff] }
  0x3b   :  { %912 = vmatprep.subr.bf16.mxu0 %v911_v9  ;;  %v95_v20 = vsel %vm93_vm1, %v92_v11, %v91_v10  ;;  %v105_v25 = vrot.slane %v60_v8, 1  ;;  %vm106_vm3 = vcmp.lt.s32.totalorder %v1157_v1, 7  ;;  %v94_v29 = vsel %vm93_vm1, %v91_v10, %v92_v11  ;;  %v1205_v42 = vld [vmem:[%s1270_s3] sm:$0xff]  ;;  %v439_v60 = vld [vmem:[#allocation7 + $0x20] sm:$0xff]  ;;  %v440_v61 = vld [vmem:[#allocation7 + $0x28] sm:$0xff]  ;;  %p1052_p13 = por %p1051_p12, %p1050_p11 }
  0x3c   :  { %vm1163_vm2 = vcmp.gt.s32.totalorder %v68_v14, 0  ;;  %v75_v23 = vand.u32 7, %v63_v16  ;;  %v923_v30 = vpack.c.bf16 %v289_v27, %v288_v26  ;;  %vm1180_vm5 = vcmp.lt.s32.totalorder %v68_v14, 7  ;;  %v441_v62 = vld [vmem:[#allocation7 + $0x30] sm:$0xff]  ;;  %v442_v2 = vld [vmem:[#allocation7 + $0x38] sm:$0xff]  ;;  %v434_v4 = vld [vmem:[#allocation7] sm:$0xff] }
  0x3d   :  { %v100_v22 = vsel %vm1163_vm2, %v95_v20, 0.0  ;;  %v107_v34 = vsel %vm106_vm3, %v104_v24, %v105_v25  ;;  %v927_v36 = vpack.c.bf16 %v291_v32, %v290_v31  ;;  %v108_v39 = vsel %vm106_vm3, %v105_v25, %v104_v24  ;;  %v435_v5 = vld [vmem:[#allocation7 + $0x8] sm:$0xff]  ;;  %v436_v26 = vld [vmem:[#allocation7 + $0x10] sm:$0xff]  ;;  %v437_v27 = vld [vmem:[#allocation7 + $0x18] sm:$0xff]  ;;  %p1053_p0 = pnand %p1052_p13, %p1046_p10 }
  0x3e   :  { %914 = vmatpush3.bf16.msra.mxu0 %v911_v9  ;;  %vm1174_vm4 = vcmp.gt.s32.totalorder %v75_v23, 0  ;;  %v113_v37 = vsel %vm1180_vm5, %v107_v34, 0.0  ;;  %vm1192_vm6 = vcmp.lt.s32.totalorder %v75_v23, 7  ;;  %v377_v41 = vsub.s32 0, %v1157_v1  ;;  %v606_v32 = vld [vmem:[#allocation7 + $0x40] sm:$0xff]  ;;  %v607_v34 = vld [vmem:[#allocation7 + $0x48] sm:$0xff] }
  0x3f   :  { %916 = vmatprep.subr.bf16.mxu0 %v915_v15  ;;  %v101_v35 = vsel %vm1174_vm4, %v94_v29, 0.0  ;;  %v114_v40 = vsel %vm1192_vm6, %v108_v39, 0.0  ;;  %v931_v63 = vpack.c.bf16 %v440_v61, %v439_v60  ;;  %v935_v3 = vpack.c.bf16 %v442_v2, %v441_v62 }
  0x40   :  { %v378_v43 = vrot.slane %v1205_v42, %v377_v41  ;;  %v939_v6 = vpack.c.bf16 %v435_v5, %v434_v4  ;;  %v410_v13 = vsub.s32 1, %v1157_v1  ;;  %v416_v14 = vsub.s32 2, %v1157_v1 }
  0x41   :  { %850 = vmatmul.mubr.msk.f32.vlgmr.msra.gmra.mrb[0].mxu0 %vm124_vm0, %v60_v8  ;;  %932 = vmatprep.subr.bf16.mxu1 %v931_v63  ;;  %v943_v31 = vpack.c.bf16 %v437_v27, %v436_v26  ;;  %v695_v28 = vsub.s32 3, %v1157_v1  ;;  %v752_v5 = vrot.slane %v1205_v42, 7 }
  0x42   :  { %918 = vmatpush3.bf16.msra.mxu0 %v915_v15  ;;  %860 = vmatprep.mubr.msk.f32.mxu0 %vm124_vm0, %v100_v22  ;;  %v411_v15 = vrot.slane %v1205_v42, %v410_v13  ;;  %v417_v18 = vrot.slane %v1205_v42, %v416_v14  ;;  %v733_v13 = vsub.s32 5, %v1157_v1 }
  0x43   :  { %920 = vmatprep.subr.bf16.mxu0 %v919_v21  ;;  %934 = vmatpush3.bf16.msra.mxu1 %v931_v63  ;;  %963 = vpush %v752_v5 }
  0x44   :  { %936 = vmatprep.subr.bf16.mxu1 %v935_v3 }
  0x46   :  { %922 = vmatpush3.bf16.msra.mxu0 %v919_v21 }
  0x47   :  { %924 = vmatprep.subr.bf16.mxu0 %v923_v30  ;;  %938 = vmatpush3.bf16.msra.mxu1 %v935_v3 }
  0x48   :  { %940 = vmatprep.subr.bf16.mxu1 %v939_v6 }
  0x49   :  { %861 = vmatmul.mubr.msk.f32.vlgmr.msra.gmra.mrb[0].mxu0 %vm124_vm0, %v101_v35 }
  0x4a   :  { %926 = vmatpush3.bf16.msra.mxu0 %v923_v30  ;;  %871 = vmatprep.mubr.msk.f32.mxu0 %vm124_vm0, %v113_v37 }
  0x4b   :  { %928 = vmatprep.subr.bf16.mxu0 %v927_v36 }
  0x4e   :  { %930 = vmatpush3.bf16.msra.mxu0 %v927_v36 }
  0x51   :  { %872 = vmatmul.mubr.msk.f32.vlgmr.msra.gmra.mrb[0].mxu0 %vm124_vm0, %v114_v40  ;;  %v947_v40 = vpack.c.bf16 %v607_v34, %v606_v32 }
  0x74   :  { %s964_s3 = spop %963 }
 0x124   :  { %v873_v44 = vpop.f32.mrb[0].mxu0 }
 0x125   :  { %v364_v45 = vpop.f32.mrb[1].mxu0  ;;  %v380_v47 = vadd.f32 %v873_v44, %v378_v43  ;;  %v608_v44 = vld [vmem:[#allocation7 + $0x50] sm:$0xff] }
 0x126   :  { %v379_v46 = vadd.f32 %v378_v43, %v364_v45  ;;  %v609_v45 = vld [vmem:[#allocation7 + $0x58] sm:$0xff] }
 0x127   :  { %v384_v49 = vsel %vm124_vm0, %v380_v47, 0.0 }
 0x128   :  { %v381_v48 = vsel %vm124_vm0, %v379_v46, 0.0 }
 0x129   :  { %382 = vadd.xlane.f32.xlu0 %v381_v48  ;;  %v951_v48 = vpack.c.bf16 %v609_v45, %v608_v44 }
 0x12d   :  { %385 = vadd.xlane.f32.xlu0 %v384_v49 }
 0x1b6   :  { %v383_v50 = vpop.xlane.xlu0 %382 }
 0x1b7   :  { %v388_v51 = vmul.f32 0.03125, %v383_v50 }
 0x1b9   :  { %v390_v52 = vsub.f32 %v379_v46, %v388_v51 }
 0x1ba   :  { %v386_v53 = vpop.xlane.xlu0 %385 }
 0x1bb   :  { %v389_v54 = vmul.f32 0.03125, %v386_v53  ;;  %v392_v55 = vmul.f32 %v390_v52, %v390_v52 }
 0x1bd   :  { %v391_v56 = vsub.f32 %v380_v47, %v389_v54  ;;  %v394_v57 = vsel %vm124_vm0, %v392_v55, 0.0 }
 0x1be   :  { %395 = vadd.xlane.f32.xlu1 %v394_v57 }
 0x1bf   :  { %v393_v58 = vmul.f32 %v391_v56, %v391_v56 }
 0x1c1   :  { %v397_v59 = vsel %vm124_vm0, %v393_v58, 0.0 }
 0x1c2   :  { %398 = vadd.xlane.f32.xlu1 %v397_v59 }
 0x24b   :  { %v396_v7 = vpop.xlane.xlu1 %395 }
 0x24c   :  { %v400_v8 = vmul.f32 0.03125, %v396_v7 }
 0x24e   :  { %v402_v9 = vadd.f32 1e-05, %v400_v8 }
 0x24f   :  { %v399_v10 = vpop.xlane.xlu1 %398 }
 0x250   :  { %971 = vrsqrt.f32 %v402_v9  ;;  %v401_v11 = vmul.f32 0.03125, %v399_v10 }
 0x252   :  { %v403_v12 = vadd.f32 1e-05, %v401_v11 }
 0x254   :  { %973 = vrsqrt.f32 %v403_v12  ;;  %v727_v12 = vsub.s32 4, %v1157_v1 }
 0x256   :  { %v728_v14 = vrot.slane %v1205_v42, %v727_v12 }
 0x25a   :  { %v972_v16 = vpop.eup %971 }
 0x25b   :  { %v406_v17 = vmul.f32 %v972_v16, %v390_v52  ;;  %v696_v52 = vrot.slane %v1205_v42, %v695_v28 }
 0x25d   :  { %v412_v20 = vmul.f32 %v411_v15, %v406_v17 }
 0x25e   :  { %v974_v21 = vpop.eup %973 }
 0x25f   :  { %v418_v22 = vadd.f32 %v417_v18, %v412_v20  ;;  %v407_v23 = vmul.f32 %v974_v21, %v391_v56  ;;  %v741_v20 = vsub.s32 6, %v1157_v1 }
 0x261   :  { %v420_v24 = vmax.f32 %v418_v22, 0.0  ;;  %v413_v25 = vmul.f32 %v411_v15, %v407_v23 }
 0x263   :  { %882 = vmatprep.mubr.msk.f32.mxu1 %vm124_vm0, %v420_v24  ;;  %v419_v29 = vadd.f32 %v417_v18, %v413_v25  ;;  %v422_v35 = vrot.slane %v420_v24, 7  ;;  %v428_v41 = vrot.slane %v420_v24, 1  ;;  %v734_v18 = vrot.slane %v1205_v42, %v733_v13 }
 0x264   :  { %v742_v25 = vrot.slane %v1205_v42, %v741_v20 }
 0x265   :  { %v421_v30 = vmax.f32 %v419_v29, 0.0 }
 0x267   :  { %883 = vmatmul.mubr.msk.f32.vlgmr.msra.gmra.mrb[0].mxu1 %vm124_vm0, %v421_v30  ;;  %v423_v36 = vrot.slane %v421_v30, 7  ;;  %v429_v37 = vrot.slane %v421_v30, 1 }
 0x268   :  { %942 = vmatpush3.bf16.msra.mxu1 %v939_v6 }
 0x269   :  { %944 = vmatprep.subr.bf16.mxu1 %v943_v31  ;;  %v425_v39 = vsel %vm93_vm1, %v423_v36, %v422_v35  ;;  %v424_v46 = vsel %vm93_vm1, %v422_v35, %v423_v36  ;;  %v430_v47 = vsel %vm106_vm3, %v428_v41, %v429_v37  ;;  %v431_v50 = vsel %vm106_vm3, %v429_v37, %v428_v41 }
 0x26a   :  { %v426_v43 = vsel %vm1163_vm2, %v425_v39, 0.0  ;;  %v427_v49 = vsel %vm1174_vm4, %v424_v46, 0.0  ;;  %v432_v19 = vsel %vm1180_vm5, %v430_v47, 0.0  ;;  %v433_v51 = vsel %vm1192_vm6, %v431_v50, 0.0 }
 0x26b   :  { %893 = vmatprep.mubr.msk.f32.mxu1 %vm124_vm0, %v426_v43  ;;  %v763_v35 = vand.u32 127, %v61_v0  ;;  %v754_v36 = vstv %s964_s3 }
 0x26c   :  { %946 = vmatpush3.bf16.msra.mxu1 %v943_v31 }
 0x26d   :  { %948 = vmatprep.subr.bf16.mxu1 %v947_v40  ;;  %v766_v39 = vsub.s32 %v763_v35, %v1157_v1 }
 0x26f   :  { %894 = vmatmul.mubr.msk.f32.vlgmr.msra.gmra.mrb[0].mxu1 %vm124_vm0, %v427_v49 }
 0x270   :  { %950 = vmatpush3.bf16.msra.mxu1 %v947_v40  ;;  %904 = vmatprep.mubr.msk.f32.mxu1 %vm124_vm0, %v432_v19 }
 0x271   :  { %952 = vmatprep.subr.bf16.mxu1 %v951_v48 }
 0x274   :  { %954 = vmatpush3.bf16.msra.mxu1 %v951_v48 }
 0x277   :  { %905 = vmatmul.mubr.msk.f32.vlgmr.msra.gmra.mrb[0].mxu1 %vm124_vm0, %v433_v51 }
 0x34a   :  { %v906_v53 = vpop.f32.mrb[0].mxu1 }
 0x34b   :  { %v698_v33 = vadd.f32 %v906_v53, %v696_v52  ;;  %v682_v54 = vpop.f32.mrb[1].mxu1 }
 0x34c   :  { %v697_v55 = vadd.f32 %v696_v52, %v682_v54 }
 0x34d   :  { %v702_v56 = vsel %vm124_vm0, %v698_v33, 0.0 }
 0x34e   :  { %703 = vadd.xlane.f32.xlu1 %v702_v56  ;;  %v699_v57 = vsel %vm124_vm0, %v697_v55, 0.0 }
 0x34f   :  { %700 = vadd.xlane.f32.xlu0 %v699_v57 }
 0x3db   :  { %v704_v58 = vpop.xlane.xlu1 %703 }
 0x3dc   :  { %v706_v59 = vmul.f32 0.03125, %v704_v58  ;;  %v701_v38 = vpop.xlane.xlu0 %700 }
 0x3dd   :  { %v705_v60 = vmul.f32 0.03125, %v701_v38 }
 0x3de   :  { %v708_v61 = vsub.f32 %v698_v33, %v706_v59 }
 0x3df   :  { %v707_v62 = vsub.f32 %v697_v55, %v705_v60 }
 0x3e0   :  { %v710_v63 = vmul.f32 %v708_v61, %v708_v61 }
 0x3e1   :  { %v709_v2 = vmul.f32 %v707_v62, %v707_v62 }
 0x3e2   :  { %v714_v3 = vsel %vm124_vm0, %v710_v63, 0.0 }
 0x3e3   :  { %715 = vadd.xlane.f32.xlu1 %v714_v3  ;;  %v711_v4 = vsel %vm124_vm0, %v709_v2, 0.0 }
 0x3e4   :  { %712 = vadd.xlane.f32.xlu0 %v711_v4 }
 0x470   :  { %v716_v6 = vpop.xlane.xlu1 %715 }
 0x471   :  { %v718_v7 = vmul.f32 0.03125, %v716_v6  ;;  %v713_v8 = vpop.xlane.xlu0 %712 }
 0x472   :  { %v717_v9 = vmul.f32 0.03125, %v713_v8 }
 0x473   :  { %v720_v10 = vadd.f32 1e-05, %v718_v7 }
 0x474   :  { %v719_v11 = vadd.f32 1e-05, %v717_v9 }
 0x475   :  { %975 = vrsqrt.f32 %v720_v10 }
 0x476   :  { %977 = vrsqrt.f32 %v719_v11 }
 0x47f   :  { %v976_v15 = vpop.eup %975 }
 0x480   :  { %v978_v16 = vpop.eup %977  ;;  %v724_v17 = vmul.f32 %v976_v15, %v708_v61 }
 0x481   :  { %v723_v21 = vmul.f32 %v978_v16, %v707_v62 }
 0x482   :  { %v730_v22 = vmul.f32 %v728_v14, %v724_v17 }
 0x483   :  { %v729_v23 = vmul.f32 %v728_v14, %v723_v21 }
 0x484   :  { %v736_v24 = vadd.f32 %v734_v18, %v730_v22 }
 0x485   :  { %v735_v26 = vadd.f32 %v734_v18, %v729_v23 }
 0x486   :  { %v738_v27 = vmax.f32 %v736_v24, 0.0 }
 0x487   :  { %v737_v29 = vmax.f32 %v735_v26, 0.0 }
 0x488   :  { %v744_v30 = vmul.f32 %v742_v25, %v738_v27 }
 0x489   :  { %v743_v31 = vmul.f32 %v742_v25, %v737_v29 }
 0x48a   :  { %v748_v32 = vsel %vm124_vm0, %v744_v30, 0.0 }
 0x48b   :  { %749 = vadd.xlane.f32.xlu1 %v748_v32  ;;  %v745_v34 = vsel %vm124_vm0, %v743_v31, 0.0 }
 0x48c   :  { %746 = vadd.xlane.f32.xlu0 %v745_v34 }
 0x518   :  { %v750_v37 = vpop.xlane.xlu1 %749 }
 0x519   :  { %v757_v40 = vadd.f32 %v754_v36, %v750_v37  ;;  %v747_v42 = vpop.xlane.xlu0 %746 }
 0x51a   :  { %v756_v41 = vadd.f32 %v754_v36, %v747_v42 }
 0x51b   :  { %v759_v43 = vmax.f32 %v757_v40, 0.0 }
 0x51c   :  { %v758_v44 = vmax.f32 %v756_v41, 0.0 }
 0x51d   :  { %v771_v45 = vrot.slane %v759_v43, %v766_v39 }
 0x51e   :  { %v767_v46 = vrot.slane %v758_v44, %v766_v39 }
 0x520   :  { %v773_v47 = vsel %vm772_vm7, %v771_v45, %v767_v46 }
 0x521   :  { %776 = vst.msk [vmem:[#allocation8] sm:$0x3] %vm775_vm8, %v773_v47 }
 0x522   :  { %1056 = shalt.err (!%p1053_p0)
}
 0x523   :  { %s1057_s5 = scalar_lea.hbm %s1271_s4, 32 }
 0x524   :  { %p1058_p1 = scmp.ne.s32.totalorder %s1271_s4, %s1057_s5  ;;  %p1061_p2 = scmp.lt.u32.totalorder %s1057_s5, %s1271_s4 }
 0x526   :  { %p1063_p3 = pnand %p1061_p2, %p1058_p1 }
 0x528   :  { %1066 = shalt.err (!%p1063_p3)
}
 0x529   :  { %786 = dma.vmem_to_hbm [thread:$0]  %s784_s27, 32, %s1271_s4, [#allocation4]  }
 0x52a   :  { %1071 = dma.done.wait [#allocation4], 32  }
 0x52b   :  { %1072 = vsyncadd [#allocation4], 4294967264 }
 0x52c   :  { %790 = vsyncpa [#allocation3], 1 }
 0x52d   :  { %791 = vsyncpa [#allocation6], 1 }
 0x52e   :  { %792 = vsyncpa [#allocation4], 1 }

</bundles_post_ra>
